<compile_context>
chip_gen: v5e
topology: v5e:2x2
jax: 0.10.0
libtpu: 0.0.40
codegen_flags: <defaults>
</compile_context>

<pallas_src>
import functools

import jax
import jax.numpy as jnp
from jax.experimental import pallas as pl
from jax.experimental.pallas import tpu as pltpu


def _round_up(n: int, m: int) -> int:
    return ((n + m - 1) // m) * m


def _decomp_kernel(x_ref, res_ref, mean_ref, *, kernel_size: int):
    """Process one (row_tile, L_pad) block.

    Rows are independent series; the lane axis is already replicate-padded by
    half = (kernel_size-1)//2 at the front and >= half at the back, so the
    centered K-tap window sum needs no edge masking.  Shifts are circular lane
    rotations (pltpu.roll, XLU); each symmetric pair roll(+d) + roll(-d) is
    independent of the rotate-direction convention, and wrap-around only
    pollutes the padded tail columns (discarded by the wrapper).
    """
    half = (kernel_size - 1) // 2
    x = x_ref[...]
    lanes = x.shape[-1]

    xf = x.astype(jnp.float32)          # single cast; exact f32 accumulation
    acc = xf                            # center tap -> no zeros init
    for d in range(1, half + 1):
        acc = acc + pltpu.roll(xf, shift=d, axis=1) \
                  + pltpu.roll(xf, shift=lanes - d, axis=1)

    mean = (acc * (1.0 / kernel_size)).astype(x.dtype)
    mean_ref[...] = mean
    res_ref[...] = x - mean


def series_decomp(x: jax.Array, kernel_size: int, *, row_tile_max: int = 512):
    """Returns (res, moving_mean), each with the same shape/dtype as x (B, L, C)."""
    if kernel_size < 1 or kernel_size % 2 != 1:
        # The PyTorch module silently assumes an odd kernel; make it explicit.
        raise ValueError(f"series_decomp requires an odd kernel_size >= 1, got {kernel_size}")

    B, L, C = x.shape
    half = (kernel_size - 1) // 2
    R = B * C

    # ---- lane-dense layout: one series per row, time on lanes -------------
    x2 = jnp.transpose(x, (0, 2, 1)).reshape(R, L)

    # Pad lanes to a multiple of 128 with the replicate padding baked in:
    # [ x[0]*half | x[0..L-1] | x[L-1]*(L_pad - L - half) ]
    L_pad = _round_up(L + 2 * half, 128)
    end_pad = L_pad - L - half
    parts = []
    if half > 0:
        parts.append(jnp.broadcast_to(x2[:, :1], (R, half)))
    parts.append(x2)
    if end_pad > 0:
        parts.append(jnp.broadcast_to(x2[:, L - 1:L], (R, end_pad)))
    xp = jnp.concatenate(parts, axis=1) if len(parts) > 1 else x2   # (R, L_pad)

    # Row tiling: big tiles (multiple of 8), rows padded to the tile size.
    row_tile = min(row_tile_max, _round_up(R, 8))
    R_pad = _round_up(R, row_tile)
    if R_pad != R:
        xp = jnp.pad(xp, ((0, R_pad - R), (0, 0)))

    grid = (R_pad // row_tile,)
    blk = pl.BlockSpec((row_tile, L_pad), lambda i: (i, 0))

    kernel = functools.partial(_decomp_kernel, kernel_size=kernel_size)
    res_p, mean_p = pl.pallas_call(
        kernel,
        out_shape=(
            jax.ShapeDtypeStruct((R_pad, L_pad), x.dtype),
            jax.ShapeDtypeStruct((R_pad, L_pad), x.dtype),
        ),
        grid=grid,
        in_specs=[blk],
        out_specs=(blk, blk),
        compiler_params=pltpu.CompilerParams(
            dimension_semantics=("parallel",),
            vmem_limit_bytes=48 * 1024 * 1024,
        ),
    )(xp)

    def _unpack(y):
        y = y[:R, half:half + L]                       # drop row/lane padding
        return jnp.transpose(y.reshape(B, C, L), (0, 2, 1))

    return _unpack(res_p), _unpack(mean_p)


def _reference(x: jax.Array, kernel_size: int):
    # Pure-JAX reference mirroring the PyTorch forward.
    half = (kernel_size - 1) // 2
    front = jnp.repeat(x[:, 0:1, :], half, axis=1)
    end = jnp.repeat(x[:, -1:, :], half, axis=1)
    xp = jnp.concatenate([front, x, end], axis=1)
    windows = jnp.stack([xp[:, j:j + x.shape[1], :] for j in range(kernel_size)], axis=0)
    mean = jnp.mean(windows, axis=0)
    return x - mean, mean


if __name__ == "__main__":
    key = jax.random.PRNGKey(0)

    configs = [
        # (B, L, C, kernel_size) — small shapes consistent with DLinear inputs.
        (2, 16, 8, 5),
        (3, 24, 7, 7),   # exercises non-multiple-of-8 rows + padding path
    ]

    ok = True
    for i, (B, L, C, K) in enumerate(configs):
        x = jax.random.normal(jax.random.fold_in(key, i), (B, L, C), dtype=jnp.float32)

        res, mean = series_decomp(x, K)
        jax.block_until_ready((res, mean))

        res_ref, mean_ref = _reference(x, K)
        ok &= bool(jnp.allclose(mean, mean_ref, atol=1e-5, rtol=1e-5))
        ok &= bool(jnp.allclose(res, res_ref, atol=1e-5, rtol=1e-5))

    assert ok, "Pallas series_decomp does not match reference"
    print("KERNEL_OK")
</pallas_src>

<mosaic_0001>
module attributes {stable_mosaic.version = 11 : i64} {
  func.func @_decomp_kernel(%arg0: i32, %arg1: memref<16x128xf32, #tpu.memory_space<vmem>>, %arg2: memref<16x128xf32, #tpu.memory_space<vmem>>, %arg3: memref<16x128xf32, #tpu.memory_space<vmem>>) attributes {dimension_semantics = [#tpu.dimension_semantics<parallel>], iteration_bounds = array<i64: 1>, scalar_prefetch = 0 : i64, scratch_operands = 0 : i64, tpu.core_type = #tpu.core_type<tc>, window_params = [{transform_indices = @transform_0, window_bounds = array<i64: 16, 128>}, {transform_indices = @transform_1, window_bounds = array<i64: 16, 128>}, {transform_indices = @transform_2, window_bounds = array<i64: 16, 128>}]} {
    %c0 = arith.constant 0 : index
    %c0_0 = arith.constant 0 : index
    %0 = vector.load %arg1[%c0, %c0_0] : memref<16x128xf32, #tpu.memory_space<vmem>>, vector<16x128xf32>
    %c1_i32 = arith.constant 1 : i32
    %1 = tpu.dynamic_rotate %0 by %c1_i32 dim 1 : vector<16x128xf32>, i32 -> vector<16x128xf32>
    %2 = arith.addf %0, %1 : vector<16x128xf32>
    %c127_i32 = arith.constant 127 : i32
    %3 = tpu.dynamic_rotate %0 by %c127_i32 dim 1 : vector<16x128xf32>, i32 -> vector<16x128xf32>
    %4 = arith.addf %2, %3 : vector<16x128xf32>
    %c2_i32 = arith.constant 2 : i32
    %5 = tpu.dynamic_rotate %0 by %c2_i32 dim 1 : vector<16x128xf32>, i32 -> vector<16x128xf32>
    %6 = arith.addf %4, %5 : vector<16x128xf32>
    %c126_i32 = arith.constant 126 : i32
    %7 = tpu.dynamic_rotate %0 by %c126_i32 dim 1 : vector<16x128xf32>, i32 -> vector<16x128xf32>
    %8 = arith.addf %6, %7 : vector<16x128xf32>
    %cst = arith.constant 2.000000e-01 : f32
    %9 = vector.broadcast %cst : f32 to vector<16x128xf32>
    %10 = arith.mulf %8, %9 : vector<16x128xf32>
    %c0_1 = arith.constant 0 : index
    %c0_2 = arith.constant 0 : index
    %11 = vector.load %arg3[%c0_1, %c0_2] : memref<16x128xf32, #tpu.memory_space<vmem>>, vector<16x128xf32>
    tpu.vector_store %arg3[%c0_1, %c0_2], %10 {strides = array<i32>} : memref<16x128xf32, #tpu.memory_space<vmem>>, vector<16x128xf32>,
    %12 = arith.subf %0, %10 : vector<16x128xf32>
    %c0_3 = arith.constant 0 : index
    %c0_4 = arith.constant 0 : index
    %13 = vector.load %arg2[%c0_3, %c0_4] : memref<16x128xf32, #tpu.memory_space<vmem>>, vector<16x128xf32>
    tpu.vector_store %arg2[%c0_3, %c0_4], %12 {strides = array<i32>} : memref<16x128xf32, #tpu.memory_space<vmem>>, vector<16x128xf32>,
    return
  }
  func.func @transform_0(%arg0: i32) -> (i32, i32) {
    %c0_i32 = arith.constant 0 : i32
    %c0_i32_0 = arith.constant 0 : i32
    return %arg0, %c0_i32 : i32, i32
  }
  func.func @transform_1(%arg0: i32) -> (i32, i32) {
    %c0_i32 = arith.constant 0 : i32
    %c0_i32_0 = arith.constant 0 : i32
    return %arg0, %c0_i32 : i32, i32
  }
  func.func @transform_2(%arg0: i32) -> (i32, i32) {
    %c0_i32 = arith.constant 0 : i32
    %c0_i32_0 = arith.constant 0 : i32
    return %arg0, %c0_i32 : i32, i32
  }
}

</mosaic_0001>

<bundles_post_ra>
// kernel: tpu_custom_call.1
= control target key start
LH: loop header
LB: loop body
LE: loop exit
PB: predicated region body
PF: predicated region fallthrough
CT: control target
= control target key end

     0   :  { %8 = vsyncpa [#allocation3], 0  ;;  %s228_s0 = inlined_call_operand.hbm [shape: f32[16,128], index: 0, kind: input, shape index: {}]   ;;  %s229_s1 = inlined_call_operand.hbm [shape: f32[16,128], index: 1, kind: output, shape index: {0}]   ;;  %s230_s2 = inlined_call_operand.hbm [shape: f32[16,128], index: 2, kind: output, shape index: {1}]  }
   0x1   :  { %9 = vsyncpa [#allocation4], 0 }
   0x2   :  { %10 = vsyncpa [#allocation7], 0  ;;  %s15_s11 = sshll.u32 %s228_s0, 4  ;;  %s186_s12 = smov [#allocation2]   ;;  %s16_s11 = int_to_ptr.hbm [resolvable:$true] %s15_s11 }
   0x3   :  { %s17_s13 = sshll.u32 %s186_s12, 4  ;;  %s187_s14 = smov 128   ;;  %s18_s13 = int_to_ptr.vmem [resolvable:$true] %s17_s13 }
   0x4   :  { %s188_s15 = smov 8  }
   0x5   :  { %23 = dma.hbm_to_vmem [thread:$0]  %s16_s11, 256, %s18_s13, [#allocation3], %s187_s14, %s187_s14, %s188_s15  }
   0x6   :  { %180 = dma.done.wait [#allocation3], 256  }
   0x7   :  { %181 = vsyncadd [#allocation3], 4294967040  ;;  %v28_v0 = vld [vmem:[#allocation2] sm:$0xff]  ;;  %s189_s16 = smov 127   ;;  %s190_s17 = smov 1   ;;  %v29_v1 = vld [vmem:[#allocation2 + $0x8] sm:$0xff] }
   0x8   :  { %36 = vrot.lane.b32.xlu1 %v28_v0, %s189_s16  ;;  %30 = vrot.lane.b32.xlu0 %v28_v0, %s190_s17  ;;  %s191_s18 = smov 2   ;;  %s192_s0 = smov 126  }
   0x9   :  { %42 = vrot.lane.b32.xlu2 %v28_v0, %s191_s18  ;;  %s193_s19 = smov [#allocation6]   ;;  %s81_s23 = sshll.u32 %s230_s2, 4  ;;  %s82_s23 = int_to_ptr.hbm [resolvable:$true] %s81_s23 }
   0xa   :  { %s79_s20 = sshll.u32 %s193_s19, 4  ;;  %s194_s24 = smov [#allocation5]   ;;  %s80_s20 = int_to_ptr.vmem [resolvable:$true] %s79_s20 }
   0xb   :  { %s66_s25 = sshll.u32 %s194_s24, 4  ;;  %s68_s28 = sshll.u32 %s229_s1, 4  ;;  %s67_s25 = int_to_ptr.vmem [resolvable:$true] %s66_s25  ;;  %s69_s28 = int_to_ptr.hbm [resolvable:$true] %s68_s28 }
  0x10   :  { %38 = vrot.lane.b32.xlu1 %v29_v1, %s189_s16  ;;  %32 = vrot.lane.b32.xlu0 %v29_v1, %s190_s17 }
  0x11   :  { %44 = vrot.lane.b32.xlu2 %v29_v1, %s191_s18 }
  0x18   :  { %50 = vrot.lane.b32.xlu1 %v29_v1, %s192_s0  ;;  %48 = vrot.lane.b32.xlu0 %v28_v0, %s192_s0 }
  0x63   :  { %v43_v4 = vpop.permute.xlu2 %42 }
  0x6b   :  { %v45_v11 = vpop.permute.xlu2 %44 }
  0x7a   :  { %v37_v2 = vpop.permute.xlu1 %36  ;;  %v31_v3 = vpop.permute.xlu0 %30 }
  0x7b   :  { %v34_v5 = vadd.f32 %v31_v3, %v28_v0 }
  0x7d   :  { %v40_v9 = vadd.f32 %v37_v2, %v34_v5 }
  0x7f   :  { %v46_v12 = vadd.f32 %v43_v4, %v40_v9 }
  0x82   :  { %v39_v6 = vpop.permute.xlu1 %38  ;;  %v33_v7 = vpop.permute.xlu0 %32 }
  0x83   :  { %v35_v8 = vadd.f32 %v33_v7, %v29_v1 }
  0x85   :  { %v41_v10 = vadd.f32 %v39_v6, %v35_v8 }
  0x87   :  { %v47_v13 = vadd.f32 %v45_v11, %v41_v10 }
  0x8a   :  { %v51_v14 = vpop.permute.xlu1 %50  ;;  %v49_v15 = vpop.permute.xlu0 %48 }
  0x8b   :  { %v53_v16 = vadd.f32 %v51_v14, %v47_v13  ;;  %v52_v17 = vadd.f32 %v49_v15, %v46_v12 }
  0x8d   :  { %v55_v18 = vmul.f32 0.2, %v53_v16  ;;  %v54_v19 = vmul.f32 0.2, %v52_v17 }
  0x8f   :  { %57 = vst [vmem:[#allocation6 + $0x8] sm:$0xff] %v55_v18  ;;  %v59_v20 = vsub.f32 %v29_v1, %v55_v18  ;;  %v58_v21 = vsub.f32 %v28_v0, %v54_v19 }
  0x90   :  { %56 = vst [vmem:[#allocation6] sm:$0xff] %v54_v19 }
  0x91   :  { %61 = vst [vmem:[#allocation5 + $0x8] sm:$0xff] %v59_v20  ;;  %87 = dma.vmem_to_hbm [thread:$0]  %s80_s20, 256, %s82_s23, [#allocation7], %s187_s14, %s187_s14, %s188_s15  }
  0x92   :  { %60 = vst [vmem:[#allocation5] sm:$0xff] %v58_v21 }
  0x93   :  { %74 = dma.vmem_to_hbm [thread:$0]  %s67_s25, 256, %s69_s28, [#allocation4], %s187_s14, %s187_s14, %s188_s15  }
  0x94   :  { %182 = dma.done.wait [#allocation4], 256  }
  0x95   :  { %183 = vsyncadd [#allocation4], 4294967040 }
  0x96   :  { %184 = dma.done.wait [#allocation7], 256  }
  0x97   :  { %185 = vsyncadd [#allocation7], 4294967040 }
  0x98   :  { %96 = vsyncpa [#allocation3], 1 }
  0x99   :  { %97 = vsyncpa [#allocation4], 1 }
  0x9a   :  { %98 = vsyncpa [#allocation7], 1 }

</bundles_post_ra>
